<compile_context>
chip_gen: v7x
topology: tpu7x:2x2x1
jax: 0.10.0
libtpu: 0.0.40
codegen_flags: <defaults>
</compile_context>

<pallas_src>
import functools

import jax
import jax.numpy as jnp
from jax.experimental import pallas as pl
from jax.experimental.pallas import tpu as pltpu


FEATURES = 22        # layer.size / LayerNorm features in the spec
EPS = 1e-6
N_LAYERS = 6

# Rows per grid step.  A (TILE_M, 22) tile pads to TILE_M * 128 lanes * 4 B in VMEM
# (~1 MiB at TILE_M=2048); input + output, double-buffered => ~4 MiB, comfortably
# inside the scoped-VMEM default on v5e (16 MiB), v6e (32 MiB) and v7x (32 MiB).
TILE_M = 2048


def _round_up(x: int, m: int) -> int:
    return ((x + m - 1) // m) * m


def _layernorm_kernel(x_ref, g_ref, b_ref, o_ref, *, eps, features):
    """torch-style LayerNorm on one (TILE_M, features) tile.

    x_ref : (TILE_M, F)  native dtype (cast to f32 here, matching torch math in f32)
    g_ref : (1, F) f32   (gamma)
    b_ref : (1, F) f32   (beta)
    o_ref : (TILE_M, F)  x.dtype
    """
    x = x_ref[...].astype(jnp.float32)
    mean = jnp.mean(x, axis=-1, keepdims=True)
    diff = x - mean
    # torch.Tensor.std defaults to the unbiased estimator: /(N-1)
    var = jnp.sum(diff * diff, axis=-1, keepdims=True) * (1.0 / (features - 1))
    std = jnp.sqrt(var)
    y = g_ref[...] * diff / (std + eps) + b_ref[...]
    o_ref[...] = y.astype(o_ref.dtype)


def pallas_layer_norm(x, gamma, beta, *, eps=EPS, tile_m=TILE_M):
    """LayerNorm over the last axis of x (any leading shape), torch semantics."""
    orig_shape = x.shape
    f = orig_shape[-1]
    m = 1
    for s in orig_shape[:-1]:
        m *= s

    # NOTE: no dtype cast here — x goes to the kernel in its native dtype (halves
    # HBM read traffic for bf16 inputs); the kernel casts to f32 internally.
    x2d = x.reshape(m, f)

    # Tile selection + ragged-M handling: keep the sublane dim a multiple of 8.
    tm = min(tile_m, _round_up(m, 8))
    m_pad = _round_up(m, tm)
    if m_pad != m:
        x2d = jnp.pad(x2d, ((0, m_pad - m), (0, 0)))
    grid = (m_pad // tm,)

    cost = pl.CostEstimate(
        flops=8 * m_pad * f,                     # mean/center/square/sum/scale/shift
        transcendentals=m_pad,                   # one sqrt per row
        bytes_accessed=2 * m_pad * f * x2d.dtype.itemsize + 2 * f * 4,
    )

    kernel = functools.partial(_layernorm_kernel, eps=eps, features=f)
    out = pl.pallas_call(
        kernel,
        out_shape=jax.ShapeDtypeStruct((m_pad, f), x.dtype),
        grid=grid,
        in_specs=[
            pl.BlockSpec((tm, f), lambda i: (i, 0)),   # x tile marches over rows
            pl.BlockSpec((1, f), lambda i: (0, 0)),    # gamma: VMEM-resident
            pl.BlockSpec((1, f), lambda i: (0, 0)),    # beta : VMEM-resident
        ],
        out_specs=pl.BlockSpec((tm, f), lambda i: (i, 0)),
        compiler_params=pltpu.CompilerParams(
            dimension_semantics=("parallel",),         # megacore-shard the row loop
        ),
        cost_estimate=cost,
    )(x2d, gamma.reshape(1, f).astype(jnp.float32), beta.reshape(1, f).astype(jnp.float32))

    if m_pad != m:
        out = out[:m]
    return out.reshape(orig_shape)


def encoder_forward(x, mask, gamma, beta, layers=(), *, eps=EPS):
    """Encoder.forward: run the layer stack, then the final (Pallas) LayerNorm."""
    # TODO(synk): the spec never defines the per-layer module (`layer` with its
    # self-attention / feed-forward sublayers); the stack is accepted here as plain
    # JAX callables (x, mask) -> x rather than being faked as a Pallas kernel.
    for layer in layers:
        x = layer(x, mask)
    return pallas_layer_norm(x, gamma, beta, eps=eps)


if __name__ == "__main__":
    key = jax.random.PRNGKey(0)
    kx, _ = jax.random.split(key)

    batch, seq = 2, 8
    x = jax.random.normal(kx, (batch, seq, FEATURES), dtype=jnp.float32)
    mask = jnp.ones((batch, 1, seq, seq), dtype=jnp.float32)  # unused by identity layers

    # LayerNorm parameters exactly as initialized in the spec.
    gamma = jnp.ones((FEATURES,), jnp.float32)
    beta = jnp.zeros((FEATURES,), jnp.float32)

    # `layer` is undefined in the spec -> use identity layers for the demo stack.
    identity_layers = tuple((lambda x_, m_: x_) for _ in range(N_LAYERS))

    out = encoder_forward(x, mask, gamma, beta, layers=identity_layers)
    out = jax.block_until_ready(out)

    # Plain-JAX reference of the torch LayerNorm semantics (unbiased std, eps on std).
    mean = x.mean(-1, keepdims=True)
    std = jnp.sqrt(((x - mean) ** 2).sum(-1, keepdims=True) / (FEATURES - 1))
    ref = gamma * (x - mean) / (std + EPS) + beta

    assert out.shape == (batch, seq, FEATURES), out.shape
    assert jnp.allclose(out, ref, atol=1e-5, rtol=1e-5), "mismatch vs reference"

    print("KERNEL_OK")
</pallas_src>

<mosaic_0001>
module attributes {stable_mosaic.version = 11 : i64} {
  func.func @_layernorm_kernel(%arg0: i32, %arg1: memref<16x22xf32, #tpu.memory_space<vmem>>, %arg2: memref<1x22xf32, #tpu.memory_space<vmem>>, %arg3: memref<1x22xf32, #tpu.memory_space<vmem>>, %arg4: memref<16x22xf32, #tpu.memory_space<vmem>>) attributes {dimension_semantics = [#tpu.dimension_semantics<parallel>], iteration_bounds = array<i64: 1>, scalar_prefetch = 0 : i64, scratch_operands = 0 : i64, tpu.core_type = #tpu.core_type<tc>, window_params = [{transform_indices = @transform_0, window_bounds = array<i64: 16, 22>}, {pipeline_mode = #tpu.pipeline_mode<synchronous>, transform_indices = @transform_1, window_bounds = array<i64: 1, 22>}, {pipeline_mode = #tpu.pipeline_mode<synchronous>, transform_indices = @transform_2, window_bounds = array<i64: 1, 22>}, {transform_indices = @transform_3, window_bounds = array<i64: 16, 22>}]} {
    %c0 = arith.constant 0 : index
    %c0_0 = arith.constant 0 : index
    %0 = vector.load %arg1[%c0, %c0_0] : memref<16x22xf32, #tpu.memory_space<vmem>>, vector<16x22xf32>
    %cst = arith.constant dense<0.000000e+00> : vector<16xf32>
    %1 = vector.multi_reduction <add>, %0, %cst [1] : vector<16x22xf32> to vector<16xf32>
    %2 = vector.shape_cast %1 : vector<16xf32> to vector<16x1xf32>
    %cst_1 = arith.constant 2.200000e+01 : f32
    %3 = vector.broadcast %cst_1 : f32 to vector<16x1xf32>
    %4 = arith.divf %2, %3 : vector<16x1xf32>
    %5 = vector.broadcast %4 : vector<16x1xf32> to vector<16x22xf32>
    %6 = arith.subf %0, %5 : vector<16x22xf32>
    %7 = arith.mulf %6, %6 : vector<16x22xf32>
    %cst_2 = arith.constant dense<0.000000e+00> : vector<16xf32>
    %8 = vector.multi_reduction <add>, %7, %cst_2 [1] : vector<16x22xf32> to vector<16xf32>
    %9 = vector.shape_cast %8 : vector<16xf32> to vector<16x1xf32>
    %cst_3 = arith.constant 0.0476190485 : f32
    %10 = vector.broadcast %cst_3 : f32 to vector<16x1xf32>
    %11 = arith.mulf %9, %10 : vector<16x1xf32>
    %12 = math.sqrt %11 : vector<16x1xf32>
    %c0_4 = arith.constant 0 : index
    %c0_5 = arith.constant 0 : index
    %13 = vector.load %arg2[%c0_4, %c0_5] : memref<1x22xf32, #tpu.memory_space<vmem>>, vector<1x22xf32>
    %14 = vector.broadcast %13 : vector<1x22xf32> to vector<16x22xf32>
    %15 = arith.mulf %14, %6 : vector<16x22xf32>
    %cst_6 = arith.constant 9.99999997E-7 : f32
    %16 = vector.broadcast %cst_6 : f32 to vector<16x1xf32>
    %17 = arith.addf %12, %16 : vector<16x1xf32>
    %18 = vector.broadcast %17 : vector<16x1xf32> to vector<16x22xf32>
    %19 = arith.divf %15, %18 : vector<16x22xf32>
    %c0_7 = arith.constant 0 : index
    %c0_8 = arith.constant 0 : index
    %20 = vector.load %arg3[%c0_7, %c0_8] : memref<1x22xf32, #tpu.memory_space<vmem>>, vector<1x22xf32>
    %21 = vector.broadcast %20 : vector<1x22xf32> to vector<16x22xf32>
    %22 = arith.addf %19, %21 : vector<16x22xf32>
    %c0_9 = arith.constant 0 : index
    %c0_10 = arith.constant 0 : index
    %23 = vector.load %arg4[%c0_9, %c0_10] : memref<16x22xf32, #tpu.memory_space<vmem>>, vector<16x22xf32>
    tpu.vector_store %arg4[%c0_9, %c0_10], %22 {strides = array<i32>} : memref<16x22xf32, #tpu.memory_space<vmem>>, vector<16x22xf32>,
    return
  }
  func.func @transform_0(%arg0: i32) -> (i32, i32) {
    %c0_i32 = arith.constant 0 : i32
    %c0_i32_0 = arith.constant 0 : i32
    return %arg0, %c0_i32 : i32, i32
  }
  func.func @transform_1(%arg0: i32) -> (i32, i32) {
    %c0_i32 = arith.constant 0 : i32
    %c0_i32_0 = arith.constant 0 : i32
    %c0_i32_1 = arith.constant 0 : i32
    return %c0_i32, %c0_i32_0 : i32, i32
  }
  func.func @transform_2(%arg0: i32) -> (i32, i32) {
    %c0_i32 = arith.constant 0 : i32
    %c0_i32_0 = arith.constant 0 : i32
    %c0_i32_1 = arith.constant 0 : i32
    return %c0_i32, %c0_i32_0 : i32, i32
  }
  func.func @transform_3(%arg0: i32) -> (i32, i32) {
    %c0_i32 = arith.constant 0 : i32
    %c0_i32_0 = arith.constant 0 : i32
    return %arg0, %c0_i32 : i32, i32
  }
}

</mosaic_0001>

<bundles_post_ra>
// kernel: tpu_custom_call.1
= control target key start
LH: loop header
LB: loop body
LE: loop exit
PB: predicated region body
PF: predicated region fallthrough
CT: control target
= control target key end

     0   :  { %8 = vsyncpa [#allocation3], 0  ;;  %s238_s0 = inlined_call_operand.hbm [shape: f32[16,22], index: 0, kind: input, shape index: {}]   ;;  %s239_s1 = inlined_call_operand.vmem [shape: f32[1,22], index: 1, kind: input, shape index: {}]   ;;  %s240_s2 = inlined_call_operand.vmem [shape: f32[1,22], index: 2, kind: input, shape index: {}]   ;;  %s241_s3 = inlined_call_operand.hbm [shape: f32[16,22], index: 3, kind: output, shape index: {}]  }
   0x1   :  { %9 = vsyncpa [#allocation4], 0  ;;  %s172_s12 = smov [#allocation2]   ;;  %s124_s16 = scalar_lea.hbm %s238_s0, 256 }
   0x2   :  { %s15_s13 = sshll.u32 %s172_s12, 4  ;;  %p125_p0 = scmp.ne.s32.totalorder %s238_s0, %s124_s16  ;;  %s16_s13 = int_to_ptr.vmem [resolvable:$true] %s15_s13 }
   0x3   :  { %p128_p1 = scmp.lt.u32.totalorder %s124_s16, %s238_s0 }
   0x5   :  { %p130_p2 = pnand %p128_p1, %p125_p0 }
   0x7   :  { %133 = shalt.err (!%p130_p2)
}
   0x8   :  { %s134_s21 = scalar_lea.vmem %s16_s13, 256  ;;  %p139_p4 = scmp.lt.s32.totalorder %s16_s13, %s16_s13 }
   0x9   :  { %p135_p3 = scmp.ne.s32.totalorder %s16_s13, %s134_s21  ;;  %p140_p5 = scmp.lt.s32.totalorder %s134_s21, %s134_s21 }
   0xb   :  { %p141_p6 = por %p140_p5, %p139_p4 }
   0xd   :  { %p142_p7 = pnand %p141_p6, %p135_p3 }
   0xf   :  { %145 = shalt.err (!%p142_p7)
}
  0x10   :  { %s173_s22 = smov 128   ;;  %s174_s23 = smov 8  }
  0x11   :  { %21 = dma.hbm_to_vmem [thread:$0]  %s238_s0, 256, %s16_s13, [#allocation3], %s173_s22, %s173_s22, %s174_s23  }
  0x12   :  { %168 = dma.done.wait [#allocation3], 256  }
  0x13   :  { %169 = vsyncadd [#allocation3], 4294967040  ;;  %vm31_vm0 = vcmask 179200   ;;  %v29_v0 = vld [vmem:[#allocation2] sm:$0xff]  ;;  %v30_v1 = vld [vmem:[#allocation2 + $0x8] sm:$0xff]  ;;  %s175_s29 = smov [#allocation5]  }
  0x14   :  { %v32_v2 = vsel %vm31_vm0, %v29_v0, 0.0  ;;  %v35_v3 = vsel %vm31_vm0, %v30_v1, 0.0  ;;  %v110_v30 = vld [vmem:[%s239_s1] ss:$0 sm:$0xff]  ;;  %s98_s30 = sshll.u32 %s175_s29, 4  ;;  %s99_s30 = int_to_ptr.vmem [resolvable:$true] %s98_s30 }
  0x15   :  { %33 = vadd.xlane.f32.xlu0 %v32_v2  ;;  %v111_v33 = vld [vmem:[%s240_s2] ss:$0 sm:$0xff]  ;;  %s146_s1 = scalar_lea.vmem %s99_s30, 256  ;;  %p151_p9 = scmp.lt.s32.totalorder %s99_s30, %s99_s30 }
  0x16   :  { %p147_p8 = scmp.ne.s32.totalorder %s99_s30, %s146_s1  ;;  %p152_p10 = scmp.lt.s32.totalorder %s146_s1, %s146_s1 }
  0x18   :  { %p153_p11 = por %p152_p10, %p151_p9 }
  0x19   :  { %36 = vadd.xlane.f32.xlu0 %v35_v3 }
  0x1a   :  { %p154_p12 = pnand %p153_p11, %p147_p8 }
  0xa2   :  { %v34_v4 = vpop.xlane.xlu0 %33 }
  0xa3   :  { %v39_v5 = vmul.f32 0.045454547, %v34_v4 }
  0xa5   :  { %v41_v6 = vsub.f32 %v29_v0, %v39_v5 }
  0xa6   :  { %v37_v7 = vpop.xlane.xlu0 %36 }
  0xa7   :  { %v40_v8 = vmul.f32 0.045454547, %v37_v7  ;;  %v43_v9 = vmul.f32 %v41_v6, %v41_v6  ;;  %v74_v31 = vmul.f32 %v110_v30, %v41_v6 }
  0xa9   :  { %v42_v10 = vsub.f32 %v30_v1, %v40_v8  ;;  %v45_v11 = vsel %vm31_vm0, %v43_v9, 0.0 }
  0xaa   :  { %46 = vadd.xlane.f32.xlu1 %v45_v11 }
  0xab   :  { %v44_v12 = vmul.f32 %v42_v10, %v42_v10  ;;  %v75_v35 = vmul.f32 %v110_v30, %v42_v10 }
  0xad   :  { %v48_v13 = vsel %vm31_vm0, %v44_v12, 0.0 }
  0xae   :  { %49 = vadd.xlane.f32.xlu1 %v48_v13 }
 0x137   :  { %v47_v14 = vpop.xlane.xlu1 %46 }
 0x138   :  { %v51_v15 = vmul.f32 0.04761905, %v47_v14 }
 0x13a   :  { %116 = vrsqrt.f32 %v51_v15  ;;  %vm55_vm1 = vcmp.eq.f32.partialorder %v51_v15, inf  ;;  %v58_v20 = vand.u32 2147483648, %v51_v15  ;;  %vm57_vm2 = vcmp.eq.f32.partialorder %v51_v15, 0.0 }
 0x13b   :  { %v50_v16 = vpop.xlane.xlu1 %49 }
 0x13c   :  { %v52_v17 = vmul.f32 0.04761905, %v50_v16 }
 0x13e   :  { %118 = vrsqrt.f32 %v52_v17  ;;  %vm62_vm3 = vcmp.eq.f32.partialorder %v52_v17, inf  ;;  %v65_v26 = vand.u32 2147483648, %v52_v17  ;;  %vm64_vm4 = vcmp.eq.f32.partialorder %v52_v17, 0.0 }
 0x144   :  { %v117_v18 = vpop.eup %116 }
 0x145   :  { %v54_v19 = vmul.f32 %v117_v18, %v51_v15 }
 0x147   :  { %v56_v21 = vsel %vm55_vm1, %v51_v15, %v54_v19 }
 0x148   :  { %v119_v22 = vpop.eup %118  ;;  %v59_v23 = vsel %vm57_vm2, %v58_v20, %v56_v21 }
 0x149   :  { %v76_v24 = vadd.f32 1e-06, %v59_v23  ;;  %v61_v25 = vmul.f32 %v119_v22, %v52_v17 }
 0x14b   :  { %v63_v27 = vsel %vm62_vm3, %v52_v17, %v61_v25  ;;  %120 = vrcp.f32 %v76_v24 }
 0x14c   :  { %v66_v28 = vsel %vm64_vm4, %v65_v26, %v63_v27 }
 0x14d   :  { %v77_v29 = vadd.f32 1e-06, %v66_v28 }
 0x14f   :  { %122 = vrcp.f32 %v77_v29 }
 0x155   :  { %v121_v32 = vpop.eup %120 }
 0x156   :  { %v79_v34 = vmul.f32 %v121_v32, %v74_v31 }
 0x158   :  { %v89_v36 = vadd.f32 %v111_v33, %v79_v34 }
 0x159   :  { %v123_v37 = vpop.eup %122 }
 0x15a   :  { %v81_v38 = vmul.f32 %v123_v37, %v75_v35  ;;  %91 = vst.msk [vmem:[#allocation5] sm:$0xff] %vm31_vm0, %v89_v36 }
 0x15c   :  { %v90_v39 = vadd.f32 %v111_v33, %v81_v38 }
 0x15e   :  { %92 = vst.msk [vmem:[#allocation5 + $0x8] sm:$0xff] %vm31_vm0, %v90_v39 }
 0x15f   :  { %157 = shalt.err (!%p154_p12)
}
 0x160   :  { %s158_s5 = scalar_lea.hbm %s241_s3, 256 }
 0x161   :  { %p159_p13 = scmp.ne.s32.totalorder %s241_s3, %s158_s5  ;;  %p162_p0 = scmp.lt.u32.totalorder %s158_s5, %s241_s3 }
 0x163   :  { %p164_p1 = pnand %p162_p0, %p159_p13 }
 0x165   :  { %167 = shalt.err (!%p164_p1)
}
 0x166   :  { %104 = dma.vmem_to_hbm [thread:$0]  %s99_s30, 256, %s241_s3, [#allocation4], %s173_s22, %s173_s22, %s174_s23  }
 0x167   :  { %170 = dma.done.wait [#allocation4], 256  }
 0x168   :  { %171 = vsyncadd [#allocation4], 4294967040 }
 0x169   :  { %108 = vsyncpa [#allocation3], 1 }
 0x16a   :  { %109 = vsyncpa [#allocation4], 1 }

</bundles_post_ra>
